<compile_context>
chip_gen: v6e
topology: v6e:2x2x1
jax: 0.10.0
libtpu: 0.0.40
codegen_flags: <defaults>
</compile_context>

<pallas_src>
import functools

import jax
import jax.numpy as jnp
import numpy as np
from jax.experimental import pallas as pl
from jax.experimental.pallas import tpu as pltpu

IGNORE_LABEL = -1
_LANE = 128
_MAX_TP = 32 * 1024                       # lane-axis tile cap
_VMEM_SLAB_BUDGET = 24 * 1024 * 1024      # live (C, TP) f32 slabs budget (bytes)
_VMEM_LIMIT = 32 * 1024 * 1024            # scoped VMEM limit we request


def _exp_dtype_for_device():
    """bf16 exp on v6e / v7x (EUP bf16 path); f32 elsewhere (v5e has no bf16 EUP)."""
    try:
        kind = jax.devices()[0].device_kind.lower()
    except Exception:
        return jnp.float32
    if ("v6" in kind) or ("v7" in kind) or ("7x" in kind):
        return jnp.bfloat16
    return jnp.float32


def _choose_tile(c, hw, n):
    """Pick the pixel (lane) tile: big enough to amortize grid-step overhead,
    small enough that ~(2 double-buffered inputs + ~4 live temps) of (c, TP)
    f32 slabs stay under the VMEM budget (v7x has only 64 MiB physical)."""
    per_lane_bytes = 6 * c * 4
    cap = max(_LANE, (_VMEM_SLAB_BUDGET // per_lane_bytes) // _LANE * _LANE)
    tp = min(_MAX_TP, cap)
    hw_r = pl.cdiv(hw, _LANE) * _LANE
    tp = min(tp, hw_r)                       # don't exceed the problem size
    num_tiles = pl.cdiv(hw, tp)
    # keep >= 2 grid programs when possible so v7x's two TensorCores both work
    if n * num_tiles < 2 and tp > _LANE:
        tp = max(_LANE, (tp // 2) // _LANE * _LANE)
        num_tiles = pl.cdiv(hw, tp)
    return tp, num_tiles


# ----------------------------------------------------------------------------
# Kernel: per-pixel softmax / gather / weighted CE over a (C, TP) tile.
#   classes on sublanes, pixels on lanes; outputs are lane-dense (1, TP) rows.
# ----------------------------------------------------------------------------
def _pointwise_kernel(logits_ref, tgt_ref, w_ref, prob_ref, loss_ref, *,
                      ignore_label, exp_dtype):
    logits = logits_ref[...].astype(jnp.float32)           # (C, TP)
    tgt = tgt_ref[...]                                      # (1, TP) int32
    valid = tgt != ignore_label                             # (1, TP) bool
    t = jnp.where(valid, tgt, 0)                            # clamp ignore -> 0

    # numerically stable softmax / log-softmax over the class (sublane) axis
    m = jnp.max(logits, axis=0, keepdims=True)              # (1, TP)
    shifted = logits - m                                     # (C, TP)
    ex = jnp.exp(shifted.astype(exp_dtype)).astype(jnp.float32)
    denom = jnp.sum(ex, axis=0, keepdims=True)               # (1, TP)
    log_denom = jnp.log(denom)                                # (1, TP)

    # select-based gather of the target class (classes on sublanes)
    cls = jax.lax.broadcasted_iota(jnp.int32, logits.shape, 0)   # (C, TP)
    is_t = cls == t                                               # (C, TP) bool
    shifted_t = jnp.sum(jnp.where(is_t, shifted, 0.0), axis=0, keepdims=True)
    w_t = jnp.sum(jnp.where(is_t, w_ref[...], 0.0), axis=0, keepdims=True)

    logp = shifted_t - log_denom                              # log_softmax[t]
    p = jnp.exp(logp)                                         # softmax[t]
    loss = -w_t * logp

    # Mask with selects (NaN-safe even though the logits tail block may read
    # garbage lanes past HW): ignored / padded pixels get prob = -1, loss = 0.
    prob_ref[...] = jnp.where(valid, p, -1.0)
    loss_ref[...] = jnp.where(valid, loss, 0.0)


# ----------------------------------------------------------------------------
# Wrapper
# ----------------------------------------------------------------------------
@functools.partial(jax.jit,
                   static_argnames=("thresh", "ignore_label", "min_kept"))
def ohem_ce_loss(predict, target, weight, *, thresh=0.9, ignore_label=-1,
                 min_kept=131072):
    n, c, h, w = predict.shape
    hw = h * w
    P = n * hw

    tp, num_tiles = _choose_tile(c, hw, n)
    hwp = num_tiles * tp

    # Free reshape; no transpose / pad / extra HBM copy of the logits.
    logits = predict.reshape(n, c, hw)
    # Only the tiny int32 targets are padded; padding is marked "ignored".
    tgt = target.reshape(n, 1, hw).astype(jnp.int32)
    tgt = jnp.pad(tgt, ((0, 0), (0, 0), (0, hwp - hw)),
                  constant_values=ignore_label)
    w_col = weight.astype(jnp.float32).reshape(c, 1)

    kernel = functools.partial(_pointwise_kernel, ignore_label=ignore_label,
                               exp_dtype=_exp_dtype_for_device())

    prob, loss = pl.pallas_call(
        kernel,
        out_shape=(
            jax.ShapeDtypeStruct((n, 1, hwp), jnp.float32),   # target-class prob
            jax.ShapeDtypeStruct((n, 1, hwp), jnp.float32),   # weighted CE loss
        ),
        grid=(n, num_tiles),
        in_specs=[
            pl.BlockSpec((None, c, tp), lambda b, i: (b, 0, i)),   # logits
            pl.BlockSpec((None, 1, tp), lambda b, i: (b, 0, i)),   # targets
            pl.BlockSpec((c, 1), lambda b, i: (0, 0)),             # class weights
        ],
        out_specs=(
            pl.BlockSpec((None, 1, tp), lambda b, i: (b, 0, i)),
            pl.BlockSpec((None, 1, tp), lambda b, i: (b, 0, i)),
        ),
        compiler_params=pltpu.CompilerParams(
            dimension_semantics=("parallel", "parallel"),
            vmem_limit_bytes=_VMEM_LIMIT),
    )(logits, tgt, w_col)

    prob = prob.reshape(-1)          # (n * hwp,)
    loss = loss.reshape(-1)          # (n * hwp,)
    valid = prob >= 0.0              # ignored / padded pixels carry prob = -1

    if P <= min_kept + 1:
        # k = n_valid - 1 always, so the order statistic is just the max.
        min_threshold = jnp.max(prob)
    else:
        # Exact k-th smallest valid prob via an epilogue XLA sort.
        # TODO(synk): replace with an in-kernel prob histogram + refinement pass
        #             to avoid the O(P log P) epilogue sort on very large inputs.
        n_valid = jnp.sum(valid.astype(jnp.int32))
        sorted_p = jnp.sort(jnp.where(valid, prob, jnp.inf))
        k = jnp.clip(jnp.minimum(jnp.int32(min_kept), n_valid - 1),
                     0, sorted_p.shape[0] - 1)
        min_threshold = sorted_p[k]

    thr = jnp.maximum(min_threshold, jnp.float32(thresh))
    sel = (valid & (prob < thr)).astype(jnp.float32)
    # NOTE: empty selection yields NaN, matching torch .mean() on an empty tensor.
    return jnp.sum(loss * sel) / jnp.sum(sel)    # 'elementwise_mean'


# ----------------------------------------------------------------------------
# Pure-numpy reference of the PyTorch forward (for verification only).
# ----------------------------------------------------------------------------
def _reference(predict, target, weight, thresh=0.9, min_kept=131072):
    pred = np.asarray(predict, np.float64)
    tgt = np.asarray(target, np.int64)
    w = np.asarray(weight, np.float64)
    n, c, h, wd = pred.shape
    logits = pred.transpose(0, 2, 3, 1).reshape(-1, c)
    t = tgt.reshape(-1)
    valid = t != IGNORE_LABEL
    tt = np.where(valid, t, 0)
    m = logits.max(-1, keepdims=True)
    ex = np.exp(logits - m)
    denom = ex.sum(-1, keepdims=True)
    sm = ex / denom
    rows = np.arange(t.size)
    p = sm[rows, tt]
    logp = (logits - m)[rows, tt] - np.log(denom[:, 0])
    loss = -w[tt] * logp
    vp = np.sort(p[valid])
    k = min(min_kept, vp.size - 1)
    thr = max(vp[k], thresh)
    sel = valid & (p < thr)
    return loss[sel].mean()


if __name__ == "__main__":
    key = jax.random.PRNGKey(0)
    kp, kt = jax.random.split(key)

    N, C, H, W = 2, 4, 16, 16
    predict = jax.random.normal(kp, (N, C, H, W), jnp.float32) * 2.0
    target = jax.random.randint(kt, (N, H, W), -1, C, jnp.int32)   # -1 == ignore
    weight = 0.5 + 0.1 * jnp.arange(C, dtype=jnp.float32)          # class weights

    out = ohem_ce_loss(predict, target, weight)
    out = jax.block_until_ready(out)

    ref = _reference(predict, target, weight)
    np.testing.assert_allclose(np.asarray(out), ref, rtol=5e-3, atol=1e-4)

    print("KERNEL_OK")
</pallas_src>

<mosaic_0001>
module attributes {stable_mosaic.version = 11 : i64} {
  func.func @_pointwise_kernel(%arg0: i32, %arg1: i32, %arg2: memref<1x4x256xf32, #tpu.memory_space<vmem>>, %arg3: memref<1x1x256xi32, #tpu.memory_space<vmem>>, %arg4: memref<4x1xf32, #tpu.memory_space<vmem>>, %arg5: memref<1x1x256xf32, #tpu.memory_space<vmem>>, %arg6: memref<1x1x256xf32, #tpu.memory_space<vmem>>) attributes {dimension_semantics = [#tpu.dimension_semantics<parallel>, #tpu.dimension_semantics<parallel>], iteration_bounds = array<i64: 2, 1>, scalar_prefetch = 0 : i64, scratch_operands = 0 : i64, tpu.core_type = #tpu.core_type<tc>, window_params = [{transform_indices = @transform_0, window_bounds = array<i64: 1, 4, 256>}, {transform_indices = @transform_1, window_bounds = array<i64: 1, 1, 256>}, {pipeline_mode = #tpu.pipeline_mode<synchronous>, transform_indices = @transform_2, window_bounds = array<i64: 4, 1>}, {transform_indices = @transform_3, window_bounds = array<i64: 1, 1, 256>}, {transform_indices = @transform_4, window_bounds = array<i64: 1, 1, 256>}]} {
    %c0 = arith.constant 0 : index
    %c0_0 = arith.constant 0 : index
    %c0_1 = arith.constant 0 : index
    %0 = vector.load %arg2[%c0, %c0_0, %c0_1] : memref<1x4x256xf32, #tpu.memory_space<vmem>>, vector<1x4x256xf32>
    %1 = vector.shape_cast %0 : vector<1x4x256xf32> to vector<4x256xf32>
    %c0_2 = arith.constant 0 : index
    %c0_3 = arith.constant 0 : index
    %c0_4 = arith.constant 0 : index
    %2 = vector.load %arg3[%c0_2, %c0_3, %c0_4] : memref<1x1x256xi32, #tpu.memory_space<vmem>>, vector<1x1x256xi32>
    %3 = vector.shape_cast %2 : vector<1x1x256xi32> to vector<1x256xi32>
    %c-1_i32 = arith.constant -1 : i32
    %4 = vector.broadcast %c-1_i32 : i32 to vector<1x256xi32>
    %5 = arith.cmpi ne, %3, %4 : vector<1x256xi32>
    %c0_i32 = arith.constant 0 : i32
    %6 = vector.broadcast %c0_i32 : i32 to vector<1x256xi32>
    %7 = arith.select %5, %3, %6 : vector<1x256xi1>, vector<1x256xi32>
    %cst = arith.constant dense<0xFF800000> : vector<256xf32>
    %8 = vector.multi_reduction <maximumf>, %1, %cst [0] : vector<4x256xf32> to vector<256xf32>
    %9 = vector.shape_cast %8 : vector<256xf32> to vector<1x256xf32>
    %10 = vector.broadcast %9 : vector<1x256xf32> to vector<4x256xf32>
    %11 = arith.subf %1, %10 : vector<4x256xf32>
    %12 = math.exp %11 : vector<4x256xf32>
    %cst_5 = arith.constant dense<0.000000e+00> : vector<256xf32>
    %13 = vector.multi_reduction <add>, %12, %cst_5 [0] : vector<4x256xf32> to vector<256xf32>
    %14 = vector.shape_cast %13 : vector<256xf32> to vector<1x256xf32>
    %15 = math.log %14 : vector<1x256xf32>
    %16 = tpu.iota {dimensions = array<i32: 0>} : vector<4x256xi32>
    %17 = vector.broadcast %7 : vector<1x256xi32> to vector<4x256xi32>
    %18 = arith.cmpi eq, %16, %17 : vector<4x256xi32>
    %cst_6 = arith.constant 0.000000e+00 : f32
    %19 = vector.broadcast %cst_6 : f32 to vector<4x256xf32>
    %20 = arith.select %18, %11, %19 : vector<4x256xi1>, vector<4x256xf32>
    %cst_7 = arith.constant dense<0.000000e+00> : vector<256xf32>
    %21 = vector.multi_reduction <add>, %20, %cst_7 [0] : vector<4x256xf32> to vector<256xf32>
    %22 = vector.shape_cast %21 : vector<256xf32> to vector<1x256xf32>
    %c0_8 = arith.constant 0 : index
    %c0_9 = arith.constant 0 : index
    %23 = vector.load %arg4[%c0_8, %c0_9] : memref<4x1xf32, #tpu.memory_space<vmem>>, vector<4x1xf32>
    %cst_10 = arith.constant 0.000000e+00 : f32
    %24 = vector.shape_cast %23 : vector<4x1xf32> to vector<4x1xf32>
    %25 = vector.broadcast %24 : vector<4x1xf32> to vector<4x256xf32>
    %26 = vector.broadcast %cst_10 : f32 to vector<4x256xf32>
    %27 = arith.select %18, %25, %26 : vector<4x256xi1>, vector<4x256xf32>
    %cst_11 = arith.constant dense<0.000000e+00> : vector<256xf32>
    %28 = vector.multi_reduction <add>, %27, %cst_11 [0] : vector<4x256xf32> to vector<256xf32>
    %29 = vector.shape_cast %28 : vector<256xf32> to vector<1x256xf32>
    %30 = arith.subf %22, %15 : vector<1x256xf32>
    %31 = math.exp %30 : vector<1x256xf32>
    %cst_12 = arith.constant 0.000000e+00 : f32
    %32 = vector.broadcast %cst_12 : f32 to vector<1x256xf32>
    %33 = arith.subf %32, %29 : vector<1x256xf32>
    %34 = arith.mulf %33, %30 : vector<1x256xf32>
    %cst_13 = arith.constant -1.000000e+00 : f32
    %35 = vector.broadcast %cst_13 : f32 to vector<1x256xf32>
    %36 = arith.select %5, %31, %35 : vector<1x256xi1>, vector<1x256xf32>
    %c0_14 = arith.constant 0 : index
    %c0_15 = arith.constant 0 : index
    %c0_16 = arith.constant 0 : index
    %37 = vector.load %arg5[%c0_14, %c0_15, %c0_16] : memref<1x1x256xf32, #tpu.memory_space<vmem>>, vector<1x1x256xf32>
    %38 = vector.shape_cast %37 : vector<1x1x256xf32> to vector<1x256xf32>
    %39 = vector.shape_cast %36 : vector<1x256xf32> to vector<1x1x256xf32>
    tpu.vector_store %arg5[%c0_14, %c0_15, %c0_16], %39 {strides = array<i32>} : memref<1x1x256xf32, #tpu.memory_space<vmem>>, vector<1x1x256xf32>,
    %cst_17 = arith.constant 0.000000e+00 : f32
    %40 = vector.broadcast %cst_17 : f32 to vector<1x256xf32>
    %41 = arith.select %5, %34, %40 : vector<1x256xi1>, vector<1x256xf32>
    %c0_18 = arith.constant 0 : index
    %c0_19 = arith.constant 0 : index
    %c0_20 = arith.constant 0 : index
    %42 = vector.load %arg6[%c0_18, %c0_19, %c0_20] : memref<1x1x256xf32, #tpu.memory_space<vmem>>, vector<1x1x256xf32>
    %43 = vector.shape_cast %42 : vector<1x1x256xf32> to vector<1x256xf32>
    %44 = vector.shape_cast %41 : vector<1x256xf32> to vector<1x1x256xf32>
    tpu.vector_store %arg6[%c0_18, %c0_19, %c0_20], %44 {strides = array<i32>} : memref<1x1x256xf32, #tpu.memory_space<vmem>>, vector<1x1x256xf32>,
    return
  }
  func.func @transform_0(%arg0: i32, %arg1: i32) -> (i32, i32, i32) {
    %c0_i32 = arith.constant 0 : i32
    %c0_i32_0 = arith.constant 0 : i32
    return %arg0, %c0_i32, %arg1 : i32, i32, i32
  }
  func.func @transform_1(%arg0: i32, %arg1: i32) -> (i32, i32, i32) {
    %c0_i32 = arith.constant 0 : i32
    %c0_i32_0 = arith.constant 0 : i32
    return %arg0, %c0_i32, %arg1 : i32, i32, i32
  }
  func.func @transform_2(%arg0: i32, %arg1: i32) -> (i32, i32) {
    %c0_i32 = arith.constant 0 : i32
    %c0_i32_0 = arith.constant 0 : i32
    %c0_i32_1 = arith.constant 0 : i32
    return %c0_i32, %c0_i32_0 : i32, i32
  }
  func.func @transform_3(%arg0: i32, %arg1: i32) -> (i32, i32, i32) {
    %c0_i32 = arith.constant 0 : i32
    %c0_i32_0 = arith.constant 0 : i32
    return %arg0, %c0_i32, %arg1 : i32, i32, i32
  }
  func.func @transform_4(%arg0: i32, %arg1: i32) -> (i32, i32, i32) {
    %c0_i32 = arith.constant 0 : i32
    %c0_i32_0 = arith.constant 0 : i32
    return %arg0, %c0_i32, %arg1 : i32, i32, i32
  }
}

</mosaic_0001>

<bundles_post_ra>
// kernel: ohem_ce_loss.1
= control target key start
LH: loop header
LB: loop body
LE: loop exit
PB: predicated region body
PF: predicated region fallthrough
CT: control target
= control target key end

     0   :  { %s689_s15 = smov 0   ;;  %s691_s16 = smov 0   ;;  %s789_s0 = inlined_call_operand.vmem [shape: f32[2,4,256], index: 0, kind: input, shape index: {}]   ;;  %s790_s1 = inlined_call_operand.vmem [shape: s32[2,1,256], index: 1, kind: input, shape index: {}]   ;;  %s791_s2 = inlined_call_operand.vmem [shape: f32[4,1], index: 2, kind: input, shape index: {}]   ;;  %s792_s3 = inlined_call_operand.vmem [shape: f32[2,1,256], index: 3, kind: output, shape index: {0}]   ;;  %s793_s4 = inlined_call_operand.vmem [shape: f32[2,1,256], index: 4, kind: output, shape index: {1}]  }
   0x1   :  { %s693_s17 = smov 0  }
   0x2 LB: > { %s27_s18 = sadd.s32 1, %s656_s16  ;;  %p591_p0 = scmp.ge.s32.totalorder %s660_s17, 1  ;;  %s660_s17 = sphi %s693_s17, %s15_s17   ;;  %s656_s16 = sphi %s691_s16, %s797_s16   ;;  %s652_s15 = sphi %s689_s15, %s796_s15  }
   0x3   : > { %p29_p1 = scmp.ge.s32.totalorder %s27_s18, 2  ;;  %p204_p2 = scmp.lt.s32.totalorder %s660_s17, 3 }
   0x5   : > { %s799_s18 = smov (%p29_p1, %s27_s18), 0  ;;  %p205_p3 = pnand %p591_p0, %p204_p2 }
   0x6   : > { %p254_p4 = scmp.lt.s32.totalorder (!%p205_p3), %s652_s15, 1 }
   0x7   : > { %208 = sbr.rel (%p205_p3) target bundleno = 164 (0xa4), region = 32 }
   0xc   : > { %v371_v0 = vld [vmem:[%s791_s2] sm:$0xf]  ;;  %v662_v1 = vmov 0   ;;  %s801_s15 = smov (!%p254_p4, %s652_s15), 1  ;;  %vm297_vm0 = vcmask 1043456   ;;  %v340_v19 = vlaneseq }
   0xd   : > { %626 = vset.pattern.permute.xlu0 %v662_v1  ;;  %s599_s21 = sshll.u32 %s801_s15, 3  ;;  %s715_s25 = sshll.u32 %s801_s15, 1 }
   0xe   : > { %374 = vperm.xlu0 %626, %v371_v0   ;;  %s261_s24 = scalar_lea.vmem %s789_s0, %s599_s21  ;;  %s270_s28 = scalar_lea.vmem %s790_s1, %s715_s25  ;;  %v724_v23 = vshrl.u32 %v340_v19, 7  ;;  %vm756_vm4 = vcmp.lt.s32.totalorder %v340_v19, 256 }
   0xf   : > { %v290_v2 = vld [vmem:[%s261_s24] sm:$0xff]  ;;  %s279_s5 = scalar_lea.vmem %s792_s3, %s715_s25  ;;  %s288_s8 = scalar_lea.vmem %s793_s4, %s715_s25 }
  0x10   : > { %v295_v3 = vcombine.high %v290_v2, %v290_v2  ;;  %v298_v4 = vsel %vm297_vm0, %v290_v2, -inf  ;;  %v721_v21 = vld [vmem:[%s270_s28] sm:$0x3]  ;;  %v344_v24 = vsub.s32 0, %v724_v23  ;;  %v348_v26 = vsub.s32 1, %v724_v23 }
  0x11   : > { %v299_v5 = vrot.slane %v298_v4, 4  ;;  %vm292_vm1 = vcmp.ne.s32.totalorder %v721_v21, 4294967295 }
  0x12   : > { %v305_v6 = vsel %vm297_vm0, %v295_v3, -inf  ;;  %v293_v25 = vsel %vm292_vm1, %v721_v21, 0 }
  0x13   : > { %v300_v7 = vmax.f32 %v298_v4, %v299_v5  ;;  %v306_v8 = vrot.slane %v305_v6, 4  ;;  %v732_v27 = vrot.slane %v293_v25, %v344_v24  ;;  %v734_v28 = vrot.slane %v293_v25, %v348_v26 }
  0x15   : > { %v301_v9 = vrot.slane %v300_v7, 2  ;;  %v307_v10 = vmax.f32 %v305_v6, %v306_v8  ;;  %vm350_vm2 = vcmp.eq.s32.totalorder %v724_v23, %v732_v27  ;;  %vm351_vm3 = vcmp.eq.s32.totalorder %v724_v23, %v734_v28 }
  0x16   : > { %v663_v6 = vmov 1966171168  }
  0x17   : > { %v302_v11 = vmax.f32 %v300_v7, %v301_v9  ;;  %v308_v12 = vrot.slane %v307_v10, 2  ;;  %v407_v7 = vunpack.c.l.s4 %v663_v6 }
  0x19   : > { %v303_v13 = vrot.slane %v302_v11, 1  ;;  %v309_v14 = vmax.f32 %v307_v10, %v308_v12  ;;  %v408_v8 = vunpack.c.0.s8 %v407_v7 }
  0x1b   : > { %v304_v15 = vmax.f32 %v302_v11, %v303_v13  ;;  %v310_v16 = vrot.slane %v309_v14, 1  ;;  %v411_v10 = vsub.s32 %v408_v8, %v724_v23 }
  0x1d   : > { %v311_v17 = vmax.f32 %v309_v14, %v310_v16 }
  0x1f   : > { %v314_v18 = vcombine.low %v304_v15, %v311_v17 }
  0x21   : > { %v316_v20 = vsub.f32 %v290_v2, %v314_v18 }
  0x23   : > { %v317_v22 = vmul.f32 1.442695, %v316_v20  ;;  %v353_v29 = vcombine.high %v316_v20, %v316_v20  ;;  %v355_v31 = vsel %vm350_vm2, %v316_v20, 0.0 }
  0x24   : > { %v357_v37 = vsel %vm297_vm0, %v355_v31, 0.0 }
  0x25   : > { %628 = vpow2.f32 %v317_v22  ;;  %v356_v35 = vsel %vm351_vm3, %v353_v29, 0.0  ;;  %v358_v43 = vrot.slane %v357_v37, 4 }
  0x26   : > { %v364_v40 = vsel %vm297_vm0, %v356_v35, 0.0 }
  0x27   : > { %v365_v46 = vrot.slane %v364_v40, 4  ;;  %v359_v49 = vadd.f32 %v358_v43, %v357_v37 }
  0x29   : > { %v366_v52 = vadd.f32 %v365_v46, %v364_v40  ;;  %v360_v54 = vrot.slane %v359_v49, 2 }
  0x2b   : > { %v367_v55 = vrot.slane %v366_v52, 2  ;;  %v361_v56 = vadd.f32 %v360_v54, %v359_v49 }
  0x2d   : > { %v368_v57 = vadd.f32 %v367_v55, %v366_v52  ;;  %v362_v58 = vrot.slane %v361_v56, 1 }
  0x2f   : > { %v369_v59 = vrot.slane %v368_v57, 1  ;;  %v363_v60 = vadd.f32 %v362_v58, %v361_v56 }
  0x31   : > { %v370_v63 = vadd.f32 %v369_v59, %v368_v57 }
  0x32   : > { %v629_v30 = vpop.eup %628 }
  0x33   : > { %v320_v32 = vcombine.high %v629_v30, %v629_v30  ;;  %v322_v33 = vsel %vm297_vm0, %v629_v30, 0.0 }
  0x34   : > { %v323_v34 = vrot.slane %v322_v33, 4 }
  0x35   : > { %v329_v36 = vsel %vm297_vm0, %v320_v32, 0.0 }
  0x36   : > { %v324_v38 = vadd.f32 %v323_v34, %v322_v33  ;;  %v330_v39 = vrot.slane %v329_v36, 4 }
  0x38   : > { %v325_v41 = vrot.slane %v324_v38, 2  ;;  %v331_v42 = vadd.f32 %v330_v39, %v329_v36 }
  0x3a   : > { %v326_v44 = vadd.f32 %v325_v41, %v324_v38  ;;  %v332_v45 = vrot.slane %v331_v42, 2 }
  0x3c   : > { %v327_v47 = vrot.slane %v326_v44, 1  ;;  %v333_v48 = vadd.f32 %v332_v45, %v331_v42 }
  0x3e   : > { %v328_v50 = vadd.f32 %v327_v47, %v326_v44  ;;  %v334_v51 = vrot.slane %v333_v48, 1 }
  0x40   : > { %v335_v53 = vadd.f32 %v334_v51, %v333_v48  ;;  %630 = vlog2.f32 %v328_v50 }
  0x42   : > { %632 = vlog2.f32 %v335_v53 }
  0x4d   : > { %v631_v61 = vpop.eup %630 }
  0x4e   : > { %v337_v62 = vmul.f32 0.6931472, %v631_v61 }
  0x4f   : > { %v633_v0 = vpop.eup %632 }
  0x50   : > { %v339_v1 = vmul.f32 0.6931472, %v633_v0  ;;  %v393_v2 = vsub.f32 %v363_v60, %v337_v62 }
  0x52   : > { %v394_v3 = vsub.f32 %v370_v63, %v339_v1  ;;  %v395_v4 = vmul.f32 1.442695, %v393_v2 }
  0x54   : > { %634 = vpow2.f32 %v395_v4  ;;  %v397_v5 = vmul.f32 1.442695, %v394_v3 }
  0x56   : > { %636 = vpow2.f32 %v397_v5 }
  0x61   : > { %v635_v9 = vpop.eup %634 }
  0x63   : > { %v637_v11 = vpop.eup %636 }
  0x64   : > { %v405_v12 = vcombine.low %v635_v9, %v637_v11 }
  0x66   : > { %v412_v13 = vrot.slane %v405_v12, %v411_v10 }
  0x68   : > { %v419_v14 = vrot.slane %v412_v13, %v411_v10 }
  0x6a   : > { %v421_v16 = vsel %vm292_vm1, %v419_v14, -1.0 }
  0x6b   : > { %426 = vst.msk [vmem:[%s279_s5] sm:$0x3] %vm756_vm4, %v421_v16 }
  0x89   : > { %v375_v17 = vpop.permute.xlu0 %374 }
  0x8a   : > { %v377_v18 = vsel %vm350_vm2, %v375_v17, 0.0  ;;  %v378_v20 = vsel %vm351_vm3, %v375_v17, 0.0 }
  0x8b   : > { %v379_v19 = vsel %vm297_vm0, %v377_v18, 0.0  ;;  %v386_v22 = vsel %vm297_vm0, %v378_v20, 0.0 }
  0x8c   : > { %v380_v24 = vrot.slane %v379_v19, 4  ;;  %v387_v25 = vrot.slane %v386_v22, 4 }
  0x8e   : > { %v381_v26 = vadd.f32 %v380_v24, %v379_v19  ;;  %v388_v29 = vadd.f32 %v387_v25, %v386_v22 }
  0x90   : > { %v382_v30 = vrot.slane %v381_v26, 2  ;;  %v389_v31 = vrot.slane %v388_v29, 2 }
  0x92   : > { %v383_v32 = vadd.f32 %v382_v30, %v381_v26  ;;  %v390_v33 = vadd.f32 %v389_v31, %v388_v29 }
  0x94   : > { %v384_v34 = vrot.slane %v383_v32, 1  ;;  %v391_v27 = vrot.slane %v390_v33, 1 }
  0x96   : > { %v385_v35 = vadd.f32 %v384_v34, %v383_v32  ;;  %v392_v36 = vadd.f32 %v391_v27, %v390_v33 }
  0x98   : > { %v399_v37 = vsub.f32 0.0, %v385_v35  ;;  %v400_v23 = vsub.f32 0.0, %v392_v36 }
  0x9a   : > { %v401_v28 = vmul.f32 %v399_v37, %v393_v2  ;;  %v402_v38 = vmul.f32 %v400_v23, %v394_v3 }
  0x9c   : > { %v429_v39 = vcombine.low %v401_v28, %v402_v38 }
  0x9e   : > { %v436_v40 = vrot.slane %v429_v39, %v411_v10 }
  0xa0   : > { %v443_v41 = vrot.slane %v436_v40, %v411_v10 }
  0xa2   : > { %v445_v42 = vsel %vm292_vm1, %v443_v41, 0.0 }
  0xa3   : > { %446 = vst.msk [vmem:[%s288_s8] sm:$0x3] %vm756_vm4, %v445_v42 }
  0xa4 PF: > { %s15_s17 = sadd.s32 1, %s660_s17   ;;  %s796_s15 = smov %s656_s16 }
  0xa5   : > { %p12_p5 = scmp.ge.s32.totalorder %s15_s17, 4   ;;  %s797_s16 = smov %s799_s18 }
  0xa7   :  { %14 = sbr.rel (!%p12_p5) target bundleno = 2 (0x2), region = 77 }

</bundles_post_ra>
